<compile_context>
chip_gen: v5e
topology: v5e:2x2
jax: 0.10.0
libtpu: 0.0.40
codegen_flags: <defaults>
</compile_context>

<pallas_src>
import math

import jax
import jax.numpy as jnp
from jax.experimental import pallas as pl
from jax.experimental.pallas import tpu as pltpu


def _round_up(x, m):
    return -(-x // m) * m


def _embed_kernel(pos_ref, expand_ref, tabw_ref, out_ref):
    """One-hot x table MXU matmul embedding gather.

    pos_ref    : [T, 2G] int32  global contraction-lane index for each packed
                 lookup (atom slot for columns < G, composed-block slot for
                 columns >= G); -1 means "select nothing" (padding).
    expand_ref : [2G, K] f32    0/1 matrix replicating column j across its
                 Vpad contraction lanes.
    tabw_ref   : [K, GD]        table rows pre-placed into their lane group.
    out_ref    : [T, GD]
    """
    posf = pos_ref[...].astype(jnp.float32)                         # [T, 2G]
    # Expand each packed index across its group's Vpad lanes via a tiny MXU
    # matmul.  Values are small integers (< 256 for realistic vocab sizes),
    # hence exact under any MXU pass/decomposition mode.
    expanded = jnp.dot(posf, expand_ref[...],
                       preferred_element_type=jnp.float32)          # [T, K]
    lane = jax.lax.broadcasted_iota(jnp.int32, expanded.shape, 1)
    onehot = (expanded == lane.astype(jnp.float32)).astype(tabw_ref.dtype)
    # Gather-as-matmul: each row of `onehot` has one 1 per valid lookup slot;
    # the atom row and block row of a group land in the same D-wide lane slice,
    # so the MXU's f32 accumulation yields atom_embed + block_embed directly.
    acc = jnp.dot(onehot, tabw_ref[...], preferred_element_type=jnp.float32)
    out_ref[...] = acc.astype(out_ref.dtype)


def block_embedding_forward(B, A, block_id, atom_table, block_table=None,
                            no_block_embedding=False, *,
                            tile_rows=2048, out_dtype=jnp.float32,
                            table_dtype=jnp.float32):
    """Pallas implementation of BlockEmbedding.forward.

    B:        [Nb] block (residue) types
    A:        [Nu] unit (atom) types
    block_id: [Nu] block id of each unit
    returns:  [Nu, D]  (atom_embed + block_embed, or atom_embed only)
    """
    A = jnp.asarray(A, jnp.int32)
    Nu = int(A.shape[0])
    atom_table = jnp.asarray(atom_table, table_dtype)
    n_atom, D = atom_table.shape

    if Nu == 0:
        return jnp.zeros((0, D), out_dtype)

    if no_block_embedding:
        n_block = 1
        block_table_p = jnp.zeros((1, D), table_dtype)
        comp = jnp.full((Nu,), -1, jnp.int32)          # never matches -> zero rows
    else:
        assert block_table is not None
        block_table_p = jnp.asarray(block_table, table_dtype)
        n_block, Db = block_table_p.shape
        # PyTorch's `atom_embed + block_embed` requires equal embed sizes here.
        assert Db == D, "atom_embed_size must equal block_embed_size"
        # Hoist the composed gather B[block_id] out of the kernel (tiny int gather).
        comp = jnp.asarray(B, jnp.int32)[jnp.asarray(block_id, jnp.int32)]
    # NOTE: genuinely out-of-range positive indices (>= vocab) yield zero rows
    # instead of raising (unlike torch.nn.Embedding); only -1 padding is intended.

    # Lane-dense packing: G atoms share one 128-lane output row.
    G = 128 // D if (D <= 128 and 128 % D == 0) else 1
    GD = G * D
    two_g = 2 * G                                      # atom slot + block slot per group

    # Contraction width K = 2G * Vpad, padded so K is a multiple of 128.
    step = max(1, 128 // math.gcd(two_g, 128))
    Vp = _round_up(max(n_atom, n_block), step)
    K = two_g * Vp

    # Rows / tiling: aim for >= 2 grid steps so v7x's two TensorCores both work.
    rows = -(-Nu // G)
    tr = max(8, min(tile_rows, _round_up(-(-rows // 2), 8)))
    rows_pad = _round_up(rows, tr)
    pad = rows_pad * G - Nu
    grid = (rows_pad // tr,)

    # Packed positional index stream: pos[r, g] -> atom slot, pos[r, G+g] -> block slot.
    idx_a = jnp.pad(A, (0, pad), constant_values=-1).reshape(rows_pad, G)
    idx_c = jnp.pad(comp, (0, pad), constant_values=-1).reshape(rows_pad, G)
    offs = jnp.arange(G, dtype=jnp.int32) * Vp
    pos_a = jnp.where(idx_a >= 0, idx_a + offs[None, :], -1)
    pos_c = jnp.where(idx_c >= 0, idx_c + (offs + G * Vp)[None, :], -1)
    pos = jnp.concatenate([pos_a, pos_c], axis=1).astype(jnp.int32)   # [rows_pad, 2G]

    # Expansion matrix (lane k belongs to slot k // Vp).
    lane = jnp.arange(K, dtype=jnp.int32)
    expand = (lane[None, :] // Vp ==
              jnp.arange(two_g, dtype=jnp.int32)[:, None]).astype(jnp.float32)  # [2G, K]

    # Table rows pre-placed per lane group: rows [j*Vp + t] hold (atom table if
    # j < G else block table) row t in lane slice [(j mod G)*D : (j mod G + 1)*D).
    def _place(tbl, n):
        tpad = jnp.zeros((Vp, D), table_dtype).at[:n].set(tbl)
        eye = jnp.eye(G, dtype=table_dtype)
        return (eye[:, None, :, None] * tpad[None, :, None, :]).reshape(G, Vp, GD)

    tab_wide = jnp.concatenate([_place(atom_table, n_atom),
                                _place(block_table_p, n_block)], axis=0)
    tab_wide = tab_wide.reshape(K, GD)

    out_bytes = jnp.dtype(out_dtype).itemsize
    tab_bytes = jnp.dtype(table_dtype).itemsize
    cost = pl.CostEstimate(
        flops=int(2 * rows_pad * K * (GD + two_g)),
        transcendentals=0,
        bytes_accessed=int(rows_pad * GD * out_bytes + rows_pad * two_g * 4
                           + K * GD * tab_bytes + two_g * K * 4),
    )

    out = pl.pallas_call(
        _embed_kernel,
        out_shape=jax.ShapeDtypeStruct((rows_pad, GD), out_dtype),
        grid=grid,
        in_specs=[
            pl.BlockSpec((tr, two_g), lambda i: (i, 0)),
            pl.BlockSpec((two_g, K), lambda i: (0, 0)),    # VMEM-resident across grid
            pl.BlockSpec((K, GD), lambda i: (0, 0)),       # VMEM-resident across grid
        ],
        out_specs=pl.BlockSpec((tr, GD), lambda i: (i, 0)),
        compiler_params=pltpu.CompilerParams(
            dimension_semantics=("parallel",),
        ),
        cost_estimate=cost,
    )(pos, expand, tab_wide)

    # Un-pack lane groups back to [Nu, D] and drop padding rows.
    return out.reshape(rows_pad * G, D)[:Nu]


if __name__ == "__main__":
    # Module hyperparameters.
    num_block_type = 6
    num_atom_type = 5
    atom_embed_size = 32
    block_embed_size = 32

    key = jax.random.PRNGKey(0)
    k1, k2, k3, k4, k5 = jax.random.split(key, 5)

    atom_table = jax.random.normal(k1, (num_atom_type, atom_embed_size), jnp.float32)
    block_table = jax.random.normal(k2, (num_block_type, block_embed_size), jnp.float32)

    # The gather itself is exact by construction; the tolerance only covers the
    # MXU's bf16 multi-pass decomposition of f32 operands.  Any indexing bug
    # produces O(1) differences and is still caught.
    TOL = dict(atol=2e-2, rtol=2e-2)

    # Small case (single tile, single grid step).
    Nb, Nu = 4, 8
    B = jax.random.randint(k3, (Nb,), 0, num_block_type, jnp.int32)
    A = jax.random.randint(k4, (Nu,), 0, num_atom_type, jnp.int32)
    block_id = jax.random.randint(k5, (Nu,), 0, Nb, jnp.int32)

    out = jax.block_until_ready(
        block_embedding_forward(B, A, block_id, atom_table, block_table))
    ref = atom_table[A] + block_table[B[block_id]]
    assert out.shape == (Nu, atom_embed_size)
    assert jnp.allclose(out, ref, **TOL), "mismatch vs reference"

    # no_block_embedding=True path.
    out2 = jax.block_until_ready(
        block_embedding_forward(B, A, block_id, atom_table, block_table,
                                no_block_embedding=True))
    assert jnp.allclose(out2, atom_table[A], **TOL)

    # Larger case exercising the grid (>= 2 steps for v7x dual-TC + padding).
    k6, k7, k8 = jax.random.split(jax.random.PRNGKey(1), 3)
    Nb2, Nu2 = 40, 1234
    B2 = jax.random.randint(k6, (Nb2,), 0, num_block_type, jnp.int32)
    A2 = jax.random.randint(k7, (Nu2,), 0, num_atom_type, jnp.int32)
    bid2 = jax.random.randint(k8, (Nu2,), 0, Nb2, jnp.int32)
    out3 = jax.block_until_ready(
        block_embedding_forward(B2, A2, bid2, atom_table, block_table))
    ref3 = atom_table[A2] + block_table[B2[bid2]]
    assert out3.shape == (Nu2, atom_embed_size)
    assert jnp.allclose(out3, ref3, **TOL), "mismatch (tiled case)"

    # bf16 output/table variant (halves HBM writeback; looser tolerance).
    out4 = jax.block_until_ready(
        block_embedding_forward(B2, A2, bid2, atom_table, block_table,
                                out_dtype=jnp.bfloat16, table_dtype=jnp.bfloat16))
    assert out4.dtype == jnp.bfloat16
    assert jnp.allclose(out4.astype(jnp.float32), ref3, atol=1e-1, rtol=1e-1)

    print("KERNEL_OK")
</pallas_src>

<mosaic_0001>
module attributes {stable_mosaic.version = 11 : i64} {
  func.func @_embed_kernel(%arg0: i32, %arg1: memref<8x8xi32, #tpu.memory_space<vmem>>, %arg2: memref<8x128xf32, #tpu.memory_space<vmem>>, %arg3: memref<128x128xf32, #tpu.memory_space<vmem>>, %arg4: memref<8x128xf32, #tpu.memory_space<vmem>>) attributes {dimension_semantics = [#tpu.dimension_semantics<parallel>], iteration_bounds = array<i64: 1>, scalar_prefetch = 0 : i64, scratch_operands = 0 : i64, tpu.core_type = #tpu.core_type<tc>, window_params = [{transform_indices = @transform_0, window_bounds = array<i64: 8, 8>}, {pipeline_mode = #tpu.pipeline_mode<synchronous>, transform_indices = @transform_1, window_bounds = array<i64: 8, 128>}, {pipeline_mode = #tpu.pipeline_mode<synchronous>, transform_indices = @transform_2, window_bounds = array<i64: 128, 128>}, {transform_indices = @transform_3, window_bounds = array<i64: 8, 128>}]} {
    %c0 = arith.constant 0 : index
    %c0_0 = arith.constant 0 : index
    %0 = vector.load %arg1[%c0, %c0_0] : memref<8x8xi32, #tpu.memory_space<vmem>>, vector<8x8xi32>
    %1 = arith.sitofp %0 : vector<8x8xi32> to vector<8x8xf32>
    %c0_1 = arith.constant 0 : index
    %c0_2 = arith.constant 0 : index
    %2 = vector.load %arg2[%c0_1, %c0_2] : memref<8x128xf32, #tpu.memory_space<vmem>>, vector<8x128xf32>
    %cst = arith.constant dense<0.000000e+00> : vector<8x128xf32>
    %3 = tpu.matmul %1, %2, %cst {dimension_numbers = #tpu.dot_dimension_numbers<[1], [0], [0], [1], [0, 0, 1, 1], [], []>} : vector<8x8xf32>, vector<8x128xf32>, vector<8x128xf32> -> vector<8x128xf32>
    %4 = tpu.iota {dimensions = array<i32: 1>} : vector<8x128xi32>
    %5 = arith.sitofp %4 : vector<8x128xi32> to vector<8x128xf32>
    %6 = arith.cmpf oeq, %3, %5 : vector<8x128xf32>
    %7 = arith.extui %6 : vector<8x128xi1> to vector<8x128xi32>
    %8 = arith.sitofp %7 : vector<8x128xi32> to vector<8x128xf32>
    %c0_3 = arith.constant 0 : index
    %c0_4 = arith.constant 0 : index
    %9 = vector.load %arg3[%c0_3, %c0_4] : memref<128x128xf32, #tpu.memory_space<vmem>>, vector<128x128xf32>
    %cst_5 = arith.constant dense<0.000000e+00> : vector<8x128xf32>
    %10 = tpu.matmul %8, %9, %cst_5 {dimension_numbers = #tpu.dot_dimension_numbers<[1], [0], [0], [1], [0, 0, 1, 1], [], []>} : vector<8x128xf32>, vector<128x128xf32>, vector<8x128xf32> -> vector<8x128xf32>
    %c0_6 = arith.constant 0 : index
    %c0_7 = arith.constant 0 : index
    %11 = vector.load %arg4[%c0_6, %c0_7] : memref<8x128xf32, #tpu.memory_space<vmem>>, vector<8x128xf32>
    tpu.vector_store %arg4[%c0_6, %c0_7], %10 {strides = array<i32>} : memref<8x128xf32, #tpu.memory_space<vmem>>, vector<8x128xf32>,
    return
  }
  func.func @transform_0(%arg0: i32) -> (i32, i32) {
    %c0_i32 = arith.constant 0 : i32
    %c0_i32_0 = arith.constant 0 : i32
    return %arg0, %c0_i32 : i32, i32
  }
  func.func @transform_1(%arg0: i32) -> (i32, i32) {
    %c0_i32 = arith.constant 0 : i32
    %c0_i32_0 = arith.constant 0 : i32
    %c0_i32_1 = arith.constant 0 : i32
    return %c0_i32, %c0_i32_0 : i32, i32
  }
  func.func @transform_2(%arg0: i32) -> (i32, i32) {
    %c0_i32 = arith.constant 0 : i32
    %c0_i32_0 = arith.constant 0 : i32
    %c0_i32_1 = arith.constant 0 : i32
    return %c0_i32, %c0_i32_0 : i32, i32
  }
  func.func @transform_3(%arg0: i32) -> (i32, i32) {
    %c0_i32 = arith.constant 0 : i32
    %c0_i32_0 = arith.constant 0 : i32
    return %arg0, %c0_i32 : i32, i32
  }
}

</mosaic_0001>

<bundles_post_ra>
// kernel: tpu_custom_call.1
= control target key start
LH: loop header
LB: loop body
LE: loop exit
PB: predicated region body
PF: predicated region fallthrough
CT: control target
= control target key end

     0   :  { %8 = vsyncpa [#allocation3], 0  ;;  %s297_s0 = inlined_call_operand.hbm [shape: s32[8,8], index: 0, kind: input, shape index: {}]   ;;  %s298_s1 = inlined_call_operand.hbm [shape: f32[8,128], index: 1, kind: input, shape index: {}]   ;;  %s299_s2 = inlined_call_operand.hbm [shape: f32[128,128], index: 2, kind: input, shape index: {}]   ;;  %s300_s3 = inlined_call_operand.hbm [shape: f32[8,128], index: 3, kind: output, shape index: {}]  }
   0x1   :  { %9 = vsyncpa [#allocation6], 0  ;;  %s27_s14 = sshll.u32 %s298_s1, 4  ;;  %s28_s14 = int_to_ptr.hbm [resolvable:$true] %s27_s14 }
   0x2   :  { %10 = vsyncpa [#allocation4], 0  ;;  %s258_s15 = smov [#allocation5]   ;;  %s16_s19 = sshll.u32 %s297_s0, 4  ;;  %s17_s19 = int_to_ptr.hbm [resolvable:$true] %s16_s19 }
   0x3   :  { %s29_s16 = sshll.u32 %s258_s15, 4  ;;  %s259_s20 = smov [#allocation2]   ;;  %s30_s16 = int_to_ptr.vmem [resolvable:$true] %s29_s16 }
   0x4   :  { %32 = dma.hbm_to_vmem [thread:$0]  %s28_s14, 128, %s30_s16, [#allocation6]  }
   0x5   :  { %s18_s21 = sshll.u32 %s259_s20, 4  ;;  %s37_s24 = sshll.u32 %s299_s2, 4  ;;  %s19_s21 = int_to_ptr.vmem [resolvable:$true] %s18_s21  ;;  %s38_s24 = int_to_ptr.hbm [resolvable:$true] %s37_s24 }
   0x6   :  { %21 = dma.hbm_to_vmem [thread:$0]  %s17_s19, 128, %s19_s21, [#allocation3]  }
   0x7   :  { %s260_s1 = smov [#allocation7]   ;;  %s261_s26 = smov 128  }
   0x8   :  { %s39_s25 = sshll.u32 %s260_s1, 4  ;;  %s262_s27 = smov 8   ;;  %s40_s25 = int_to_ptr.vmem [resolvable:$true] %s39_s25 }
   0x9   :  { %45 = dma.hbm_to_vmem [thread:$0]  %s38_s24, 2048, %s40_s25, [#allocation6], %s261_s26, %s261_s26, %s262_s27  }
   0xa   :  { %252 = dma.done.wait [#allocation3], 128  }
   0xb   :  { %253 = vsyncadd [#allocation3], 4294967168 }
   0xc   :  { %254 = dma.done.wait [#allocation6], 2176  }
   0xd   :  { %255 = vsyncadd [#allocation6], 4294965120  ;;  %v60_v0 = vld [vmem:[#allocation5] sm:$0xff]  ;;  %v58_v1 = vld [vmem:[#allocation2] sm:$0xff]  ;;  %vm61_vm0 = vcmask 64512   ;;  %v85_v19 = vlaneseq  ;;  %v263_v23 = vmov 1.0  }
   0xe   :  { %v106_v2 = vld [vmem:[#allocation7 + $0x78] sm:$0xff]  ;;  %80 = vmatpush.msra.mxu0 %v60_v0  ;;  %v59_v3 = vcvt.s32.f32 %v58_v1  ;;  %v105_v4 = vld [vmem:[#allocation7 + $0x70] sm:$0xff]  ;;  %v104_v5 = vld [vmem:[#allocation7 + $0x68] sm:$0xff]  ;;  %s264_s0 = smov [#allocation8]   ;;  %s135_s30 = sshll.u32 %s300_s3, 4  ;;  %s136_s30 = int_to_ptr.hbm [resolvable:$true] %s135_s30 }
   0xf   :  { %107 = vmatpush.msra.mxu1 %v106_v2  ;;  %v103_v6 = vld [vmem:[#allocation7 + $0x60] sm:$0xff]  ;;  %v102_v7 = vld [vmem:[#allocation7 + $0x58] sm:$0xff]  ;;  %v101_v8 = vld [vmem:[#allocation7 + $0x50] sm:$0xff]  ;;  %v86_v20 = vand.u32 127, %v85_v19  ;;  %s133_s2 = sshll.u32 %s264_s0, 4  ;;  %s134_s2 = int_to_ptr.vmem [resolvable:$true] %s133_s2 }
  0x10   :  { %146 = vmatmul.msk.f32.vlgmr.msra.gmra.mxu0 %vm61_vm0, %v59_v3  ;;  %v100_v9 = vld [vmem:[#allocation7 + $0x48] sm:$0xff]  ;;  %v99_v10 = vld [vmem:[#allocation7 + $0x40] sm:$0xff]  ;;  %v98_v11 = vld [vmem:[#allocation7 + $0x38] sm:$0xff] }
  0x11   :  { %108 = vmatpush.msra.mxu1 %v105_v4  ;;  %v97_v12 = vld [vmem:[#allocation7 + $0x30] sm:$0xff]  ;;  %v96_v13 = vld [vmem:[#allocation7 + $0x28] sm:$0xff]  ;;  %v95_v14 = vld [vmem:[#allocation7 + $0x20] sm:$0xff]  ;;  %v87_v21 = vcvt.s32.f32 %v86_v20 }
  0x12   :  { %v94_v15 = vld [vmem:[#allocation7 + $0x18] sm:$0xff]  ;;  %v93_v16 = vld [vmem:[#allocation7 + $0x10] sm:$0xff]  ;;  %v92_v17 = vld [vmem:[#allocation7 + $0x8] sm:$0xff] }
  0x13   :  { %109 = vmatpush.msra.mxu1 %v104_v5  ;;  %v91_v18 = vld [vmem:[#allocation7] sm:$0xff] }
  0x15   :  { %110 = vmatpush.msra.mxu1 %v103_v6 }
  0x17   :  { %111 = vmatpush.msra.mxu1 %v102_v7 }
  0x19   :  { %112 = vmatpush.msra.mxu1 %v101_v8 }
  0x1b   :  { %113 = vmatpush.msra.mxu1 %v100_v9 }
  0x1d   :  { %114 = vmatpush.msra.mxu1 %v99_v10 }
  0x1f   :  { %115 = vmatpush.msra.mxu1 %v98_v11 }
  0x21   :  { %116 = vmatpush.msra.mxu1 %v97_v12 }
  0x23   :  { %117 = vmatpush.msra.mxu1 %v96_v13 }
  0x25   :  { %118 = vmatpush.msra.mxu1 %v95_v14 }
  0x27   :  { %119 = vmatpush.msra.mxu1 %v94_v15 }
  0x29   :  { %120 = vmatpush.msra.mxu1 %v93_v16 }
  0x2b   :  { %121 = vmatpush.msra.mxu1 %v92_v17 }
  0x2d   :  { %122 = vmatpush.msra.mxu1 %v91_v18 }
  0x8d   :  { %v82_v22 = vpop.f32.mrf.mxu0 }
  0x8e   :  { %vm88_vm1 = vcmp.eq.f32.partialorder %v82_v22, %v87_v21 }
  0x8f   :  { %148 = vmatmul.msk.f32.vlgmr.msra.gmra.mxu1 %vm88_vm1, %v263_v23 }
 0x10c   :  { %v124_v24 = vpop.f32.mrf.mxu1 }
 0x10d   :  { %127 = vst [vmem:[#allocation8] sm:$0xff] %v124_v24 }
 0x10e   :  { %138 = dma.vmem_to_hbm [thread:$0]  %s134_s2, 128, %s136_s30, [#allocation4]  }
 0x10f   :  { %256 = dma.done.wait [#allocation4], 128  }
 0x110   :  { %257 = vsyncadd [#allocation4], 4294967168 }
 0x111   :  { %143 = vsyncpa [#allocation3], 1 }
 0x112   :  { %144 = vsyncpa [#allocation6], 1 }
 0x113   :  { %145 = vsyncpa [#allocation4], 1 }

</bundles_post_ra>
